<compile_context>
chip_gen: v5e
topology: v5e:2x2
jax: 0.10.0
libtpu: 0.0.40
codegen_flags: <defaults>
</compile_context>

<pallas_src>
import jax
import jax.numpy as jnp
from jax.experimental import pallas as pl
from jax.experimental.pallas import tpu as pltpu


def _conv_bn_relu_kernel(x_ref, w_ref, scale_ref, shift_ref, o_ref, acc_ref):
    # x_ref:     (1, TK, THW)  one (C1-tile, HW-tile) slab of image n
    # w_ref:     (C2, TK)      C1-tile of the 1x1-conv weight matrix
    # scale_ref: (C2, 1)       folded BN scale = gamma / sqrt(var + eps)
    # shift_ref: (C2, 1)       folded BN shift = beta - mean * scale
    # o_ref:     (1, C2, THW)  output tile (lane dim = HW -> lane-dense stores)
    # acc_ref:   (C2, THW)     f32 accumulator scratch, lives across the K axis
    k = pl.program_id(2)

    @pl.when(k == 0)
    def _():
        acc_ref[...] = jnp.zeros_like(acc_ref)

    acc_ref[...] += jnp.dot(w_ref[...], x_ref[0],
                            preferred_element_type=jnp.float32)

    @pl.when(k == pl.num_programs(2) - 1)
    def _():
        y = acc_ref[...] * scale_ref[...] + shift_ref[...]
        o_ref[0] = jnp.maximum(y, 0.0).astype(o_ref.dtype)


def conv_module_forward(x_nchw, conv_weight, bn_gamma, bn_beta,
                        bn_mean, bn_var, eps=1e-5,
                        tile_hw=512, compute_dtype=None):
    """x_nchw: (N, C1, H, W); conv_weight: (C2, C1, 1, 1) -- PyTorch layouts."""
    N, C1, H, W = x_nchw.shape
    C2 = conv_weight.shape[0]
    HW = H * W
    out_dtype = x_nchw.dtype

    # ---- glue (pure JAX, no layout transposes: NCHW is already (N, C1, HW)) ----
    x = x_nchw.reshape(N, C1, HW)
    w_mat = conv_weight.reshape(C2, C1)
    scale = (bn_gamma / jnp.sqrt(bn_var + eps)).astype(jnp.float32)
    shift = (bn_beta - bn_mean * scale).astype(jnp.float32)
    scale = scale.reshape(C2, 1)
    shift = shift.reshape(C2, 1)
    # TODO(synk): PyTorch BatchNorm2d in training mode uses batch statistics;
    # this implements the standard inference-time (running-stats) semantics.

    # Optional bf16 MXU path (recommended on v6e/v7x for realistic channel
    # counts): halves HBM/DMA bytes and hits the bf16 MXU peak; accumulation
    # stays f32 and the BN/ReLU epilogue runs on the f32 accumulator.
    if compute_dtype is not None:
        x = x.astype(compute_dtype)
        w_mat = w_mat.astype(compute_dtype)

    # ---- tiling ----
    # Lane (last) dim = HW.  Tile of 512 keeps the kernel at ~85% of HBM
    # roofline while fitting v7x's 32 MiB scoped VMEM even at C1=C2=1024.
    if HW <= tile_hw:
        t_hw = HW                        # full-extent block (always legal)
        hw_pad = HW
    else:
        t_hw = tile_hw                   # multiple of 128 (default 512)
        hw_pad = pl.cdiv(HW, t_hw) * t_hw
        if hw_pad != HW:                 # ragged last tile: zero-pad once
            x = jnp.pad(x, ((0, 0), (0, 0), (0, hw_pad - HW)))

    # Tile the contraction (C1) axis only when it is large, so the (C2, TK)
    # weight and (TK, THW) activation slabs stay comfortably in VMEM.
    if C1 <= 512:
        t_k = C1
    elif C1 % 256 == 0:
        t_k = 256
    elif C1 % 128 == 0:
        t_k = 128
    else:
        t_k = C1

    grid = (N, hw_pad // t_hw, C1 // t_k)

    out = pl.pallas_call(
        _conv_bn_relu_kernel,
        out_shape=jax.ShapeDtypeStruct((N, C2, hw_pad), out_dtype),
        grid_spec=pltpu.PrefetchScalarGridSpec(
            num_scalar_prefetch=0,
            grid=grid,
            in_specs=[
                pl.BlockSpec((1, t_k, t_hw), lambda n, j, k: (n, k, j)),
                pl.BlockSpec((C2, t_k), lambda n, j, k: (0, k)),
                pl.BlockSpec((C2, 1), lambda n, j, k: (0, 0)),
                pl.BlockSpec((C2, 1), lambda n, j, k: (0, 0)),
            ],
            out_specs=pl.BlockSpec((1, C2, t_hw), lambda n, j, k: (n, 0, j)),
            scratch_shapes=[pltpu.VMEM((C2, t_hw), jnp.float32)],
        ),
        compiler_params=pltpu.CompilerParams(
            # N and HW-tile axes are independent; the C1 (reduction) axis is
            # kept last and marked 'arbitrary'.
            dimension_semantics=("parallel", "parallel", "arbitrary")),
    )(x, w_mat, scale, shift)

    if hw_pad != HW:
        out = out[:, :, :HW]
    return out.reshape(N, C2, H, W)


if __name__ == "__main__":
    key = jax.random.PRNGKey(0)
    k_x, k_w, k_g, k_b, k_m, k_v = jax.random.split(key, 6)

    N, C1, C2, H, W = 2, 4, 8, 16, 16

    x = jax.random.normal(k_x, (N, C1, H, W), dtype=jnp.float32)

    # deterministic synthetic parameters (shapes match nn.Conv2d / nn.BatchNorm2d)
    conv_weight = jax.random.normal(k_w, (C2, C1, 1, 1), dtype=jnp.float32) * 0.1
    bn_gamma = 1.0 + 0.1 * jax.random.normal(k_g, (C2,), dtype=jnp.float32)
    bn_beta = 0.1 * jax.random.normal(k_b, (C2,), dtype=jnp.float32)
    bn_mean = 0.1 * jax.random.normal(k_m, (C2,), dtype=jnp.float32)
    bn_var = jnp.abs(jax.random.normal(k_v, (C2,), dtype=jnp.float32)) + 0.5

    out = conv_module_forward(x, conv_weight, bn_gamma, bn_beta, bn_mean, bn_var)
    out = jax.block_until_ready(out)

    # lightweight sanity check against a pure-JAX reference (inference BN)
    eps = 1e-5
    ref = jnp.einsum('oc,nchw->nohw', conv_weight.reshape(C2, C1), x)
    ref = (ref - bn_mean[None, :, None, None]) \
        / jnp.sqrt(bn_var + eps)[None, :, None, None]
    ref = ref * bn_gamma[None, :, None, None] + bn_beta[None, :, None, None]
    ref = jnp.maximum(ref, 0.0)

    assert out.shape == (N, C2, H, W)
    assert jnp.allclose(out, ref, atol=1e-5, rtol=1e-5)

    print("KERNEL_OK")
</pallas_src>

<mosaic_0001>
module attributes {stable_mosaic.version = 11 : i64} {
  func.func @_conv_bn_relu_kernel(%arg0: i32, %arg1: i32, %arg2: i32, %arg3: memref<1x4x256xf32, #tpu.memory_space<vmem>>, %arg4: memref<8x4xf32, #tpu.memory_space<vmem>>, %arg5: memref<8x1xf32, #tpu.memory_space<vmem>>, %arg6: memref<8x1xf32, #tpu.memory_space<vmem>>, %arg7: memref<1x8x256xf32, #tpu.memory_space<vmem>>, %arg8: memref<8x256xf32, #tpu.memory_space<vmem>>) attributes {dimension_semantics = [#tpu.dimension_semantics<parallel>, #tpu.dimension_semantics<parallel>, #tpu.dimension_semantics<arbitrary>], iteration_bounds = array<i64: 2, 1, 1>, scalar_prefetch = 0 : i64, scratch_operands = 1 : i64, tpu.core_type = #tpu.core_type<tc>, window_params = [{transform_indices = @transform_0, window_bounds = array<i64: 1, 4, 256>}, {transform_indices = @transform_1, window_bounds = array<i64: 8, 4>}, {pipeline_mode = #tpu.pipeline_mode<synchronous>, transform_indices = @transform_2, window_bounds = array<i64: 8, 1>}, {pipeline_mode = #tpu.pipeline_mode<synchronous>, transform_indices = @transform_3, window_bounds = array<i64: 8, 1>}, {transform_indices = @transform_4, window_bounds = array<i64: 1, 8, 256>}]} {
    %c0_i32 = arith.constant 0 : i32
    %0 = arith.cmpi eq, %arg2, %c0_i32 : i32
    %1 = arith.extui %0 : i1 to i32
    %c0_i32_0 = arith.constant 0 : i32
    %2 = arith.cmpi ne, %1, %c0_i32_0 : i32
    scf.if %2 {
      %cst_11 = arith.constant 0.000000e+00 : f32
      %13 = vector.broadcast %cst_11 : f32 to vector<8x256xf32>
      %c0_12 = arith.constant 0 : index
      %c0_13 = arith.constant 0 : index
      %14 = vector.load %arg8[%c0_12, %c0_13] : memref<8x256xf32, #tpu.memory_space<vmem>>, vector<8x256xf32>
      tpu.vector_store %arg8[%c0_12, %c0_13], %13 {strides = array<i32>} : memref<8x256xf32, #tpu.memory_space<vmem>>, vector<8x256xf32>,
    } else {
    }
    %c0 = arith.constant 0 : index
    %c0_1 = arith.constant 0 : index
    %3 = vector.load %arg8[%c0, %c0_1] : memref<8x256xf32, #tpu.memory_space<vmem>>, vector<8x256xf32>
    %c0_2 = arith.constant 0 : index
    %c0_3 = arith.constant 0 : index
    %4 = vector.load %arg4[%c0_2, %c0_3] : memref<8x4xf32, #tpu.memory_space<vmem>>, vector<8x4xf32>
    %c0_4 = arith.constant 0 : index
    %c0_5 = arith.constant 0 : index
    %c0_6 = arith.constant 0 : index
    %5 = vector.load %arg3[%c0_4, %c0_5, %c0_6] : memref<1x4x256xf32, #tpu.memory_space<vmem>>, vector<1x4x256xf32>
    %6 = vector.shape_cast %5 : vector<1x4x256xf32> to vector<4x256xf32>
    %cst = arith.constant dense<0.000000e+00> : vector<8x256xf32>
    %7 = tpu.matmul %4, %6, %cst {dimension_numbers = #tpu.dot_dimension_numbers<[1], [0], [0], [1], [0, 0, 1, 1], [], []>} : vector<8x4xf32>, vector<4x256xf32>, vector<8x256xf32> -> vector<8x256xf32>
    %8 = arith.addf %3, %7 : vector<8x256xf32>
    %c0_7 = arith.constant 0 : index
    %c0_8 = arith.constant 0 : index
    %9 = vector.load %arg8[%c0_7, %c0_8] : memref<8x256xf32, #tpu.memory_space<vmem>>, vector<8x256xf32>
    tpu.vector_store %arg8[%c0_7, %c0_8], %8 {strides = array<i32>} : memref<8x256xf32, #tpu.memory_space<vmem>>, vector<8x256xf32>,
    %c0_i32_9 = arith.constant 0 : i32
    %10 = arith.cmpi eq, %arg2, %c0_i32_9 : i32
    %11 = arith.extui %10 : i1 to i32
    %c0_i32_10 = arith.constant 0 : i32
    %12 = arith.cmpi ne, %11, %c0_i32_10 : i32
    scf.if %12 {
      %c0_11 = arith.constant 0 : index
      %c0_12 = arith.constant 0 : index
      %13 = vector.load %arg8[%c0_11, %c0_12] : memref<8x256xf32, #tpu.memory_space<vmem>>, vector<8x256xf32>
      %c0_13 = arith.constant 0 : index
      %c0_14 = arith.constant 0 : index
      %14 = vector.load %arg5[%c0_13, %c0_14] : memref<8x1xf32, #tpu.memory_space<vmem>>, vector<8x1xf32>
      %15 = vector.broadcast %14 : vector<8x1xf32> to vector<8x256xf32>
      %16 = arith.mulf %13, %15 : vector<8x256xf32>
      %c0_15 = arith.constant 0 : index
      %c0_16 = arith.constant 0 : index
      %17 = vector.load %arg6[%c0_15, %c0_16] : memref<8x1xf32, #tpu.memory_space<vmem>>, vector<8x1xf32>
      %18 = vector.broadcast %17 : vector<8x1xf32> to vector<8x256xf32>
      %19 = arith.addf %16, %18 : vector<8x256xf32>
      %cst_17 = arith.constant 0.000000e+00 : f32
      %20 = vector.broadcast %cst_17 : f32 to vector<8x256xf32>
      %21 = arith.maximumf %19, %20 : vector<8x256xf32>
      %c0_18 = arith.constant 0 : index
      %c0_19 = arith.constant 0 : index
      %c0_20 = arith.constant 0 : index
      %22 = vector.load %arg7[%c0_18, %c0_19, %c0_20] : memref<1x8x256xf32, #tpu.memory_space<vmem>>, vector<1x8x256xf32>
      %23 = vector.shape_cast %22 : vector<1x8x256xf32> to vector<8x256xf32>
      %24 = vector.shape_cast %21 : vector<8x256xf32> to vector<1x8x256xf32>
      tpu.vector_store %arg7[%c0_18, %c0_19, %c0_20], %24 {strides = array<i32>} : memref<1x8x256xf32, #tpu.memory_space<vmem>>, vector<1x8x256xf32>,
    } else {
    }
    return
  }
  func.func @transform_0(%arg0: i32, %arg1: i32, %arg2: i32) -> (i32, i32, i32) {
    %c0_i32 = arith.constant 0 : i32
    return %arg0, %arg2, %arg1 : i32, i32, i32
  }
  func.func @transform_1(%arg0: i32, %arg1: i32, %arg2: i32) -> (i32, i32) {
    %c0_i32 = arith.constant 0 : i32
    %c0_i32_0 = arith.constant 0 : i32
    return %c0_i32, %arg2 : i32, i32
  }
  func.func @transform_2(%arg0: i32, %arg1: i32, %arg2: i32) -> (i32, i32) {
    %c0_i32 = arith.constant 0 : i32
    %c0_i32_0 = arith.constant 0 : i32
    %c0_i32_1 = arith.constant 0 : i32
    return %c0_i32, %c0_i32_0 : i32, i32
  }
  func.func @transform_3(%arg0: i32, %arg1: i32, %arg2: i32) -> (i32, i32) {
    %c0_i32 = arith.constant 0 : i32
    %c0_i32_0 = arith.constant 0 : i32
    %c0_i32_1 = arith.constant 0 : i32
    return %c0_i32, %c0_i32_0 : i32, i32
  }
  func.func @transform_4(%arg0: i32, %arg1: i32, %arg2: i32) -> (i32, i32, i32) {
    %c0_i32 = arith.constant 0 : i32
    %c0_i32_0 = arith.constant 0 : i32
    return %arg0, %c0_i32, %arg1 : i32, i32, i32
  }
}

</mosaic_0001>

<bundles_post_ra>
// kernel: tpu_custom_call.1
= control target key start
LH: loop header
LB: loop body
LE: loop exit
PB: predicated region body
PF: predicated region fallthrough
CT: control target
= control target key end

     0   :  { %9 = vsyncpa [#allocation4], 0  ;;  %s765_s0 = inlined_call_operand.vmem [shape: f32[2,4,256], index: 0, kind: input, shape index: {}]   ;;  %s766_s1 = inlined_call_operand.vmem [shape: f32[8,4], index: 1, kind: input, shape index: {}]   ;;  %s767_s2 = inlined_call_operand.vmem [shape: f32[8,1], index: 2, kind: input, shape index: {}]   ;;  %s768_s3 = inlined_call_operand.vmem [shape: f32[8,1], index: 3, kind: input, shape index: {}]   ;;  %s769_s4 = inlined_call_operand.hbm [shape: f32[2,8,256], index: 4, kind: output, shape index: {}]  }
   0x1   :  { %11 = vsyncpa [#allocation4 + $0x1], 0  ;;  %s659_s15 = smov 0   ;;  %s661_s16 = smov 0  }
   0x2   :  { %s663_s17 = smov 0   ;;  %s665_s18 = smov 0  }
   0x3   :  { %s667_s19 = smov 0   ;;  %s669_s20 = smov 0  }
   0x4 LB: > { %s476_s21 = sadd.s32 4294967295, %s631_s20   ;;  %s477_s22 = sadd.s32 4294967294, %s631_s20   ;;  %s631_s20 = sphi %s669_s20, %s17_s20   ;;  %s627_s19 = sphi %s667_s19, %s776_s19   ;;  %s623_s18 = sphi %s665_s18, %s775_s18   ;;  %s619_s17 = sphi %s663_s17, %s774_s17   ;;  %s615_s16 = sphi %s661_s16, %s773_s16   ;;  %s611_s15 = sphi %s659_s15, %s772_s15  }
   0x5   : > { %s36_s23 = sadd.s32 1, %s627_s19  ;;  %s143_s24 = sadd.s32 1, %s619_s17 }
   0x6   : > { %p38_p0 = scmp.ge.s32.totalorder %s36_s23, 2  ;;  %p153_p1 = scmp.ne.s32.totalorder %s619_s17, %s615_s16 }
   0x7   : > { %p154_p2 = scmp.eq.s32.totalorder %s476_s21, 1  ;;  %p159_p3 = scmp.ne.s32.totalorder %s615_s16, %s611_s15 }
   0x8   : > { %s778_s23 = smov (%p38_p0, %s36_s23), 0  ;;  %p160_p5 = scmp.eq.s32.totalorder %s477_s22, 1 }
   0x9   : > { %p699_p4 = por %p154_p2, %p153_p1  ;;  %s138_s26 = ssub.s32 %s627_s19, %s778_s23 }
   0xa   : > { %p481_p6 = scmp.ge.s32.totalorder %s631_s20, 1  ;;  %p141_p7 = scmp.eq.s32.totalorder %s138_s26, 0 }
   0xb   : > { %p706_p8 = por %p160_p5, %p159_p3  ;;  %p208_p9 = scmp.lt.s32.totalorder %s631_s20, 3 }
   0xc   : > { %s712_s28 = scalar_select %p141_p7, %s619_s17, %s143_s24  }
   0xd   : > { %p209_p10 = pnand %p481_p6, %p208_p9 }
   0xe   : > { %p247_p11 = scmp.lt.s32.totalorder (!%p209_p10), %s623_s18, 1  ;;  %s243_s14 = sand.u32 (!%p209_p10), 1, %s615_s16  }
   0xf   : > { %212 = sbr.rel (%p209_p10) target bundleno = 170 (0xaa), region = 36  ;;  %s482_s21 = sshll.u32 (!%p209_p10), %s243_s14, 4 }
  0x10   : > { %s495_s22 = sshll.u32 (!%p209_p10), %s623_s18, 4  ;;  %s245_s30 = scalar_lea.vmem (!%p209_p10), [#allocation3], %s482_s21 }
  0x11   : > { %s371_s29 = scalar_lea.hbm (!%p209_p10), %s769_s4, %s495_s22  ;;  %s573_s11 = scalar_lea.hbm (!%p209_p10), %s769_s4, 32 }
  0x14   : > { %v337_v0 = vld [vmem:[%s767_s2] sm:$0xff]  ;;  %v633_v1 = vmov 0   ;;  %s248_s5 = scalar_select %p247_p11, %s623_s18, 1  ;;  %vm283_vm0 = vcmask 1043456   ;;  %vm279_vm1 = vcmask 31744  }
  0x15   : > { %552 = vset.pattern.permute.xlu0 %v633_v1  ;;  %v345_v3 = vld [vmem:[%s768_s3] sm:$0xff]  ;;  %s358_s18 = scalar_lea.sflag [#allocation4], %s243_s14 }
  0x16   : > { %340 = vperm.xlu0 %552, %v337_v0   ;;  %s494_s6 = sshll.u32 %s248_s5, 3  ;;  %v273_v4 = vld [vmem:[%s766_s1] sm:$0xff]  ;;  %s373_s5 = sshll.u32 %s245_s30, 4  ;;  %s374_s5 = int_to_ptr.vmem [resolvable:$true] %s373_s5 }
  0x17   : > { %s258_s9 = scalar_lea.vmem %s765_s0, %s494_s6  ;;  %s375_s6 = sshll.u32 %s371_s29, 4  ;;  %s376_s6 = int_to_ptr.hbm [resolvable:$true] %s375_s6 }
  0x18   : > { %v274_v2 = vld [vmem:[%s258_s9] sm:$0xff]  ;;  %s567_s7 = sshra.s32 %s376_s6, 4  ;;  %s568_s7 = int_to_ptr.hbm [resolvable:$true] %s567_s7 }
  0x19   : > { %276 = vst [vmem:[#allocation1] ss:$2 sm:$0xff] %v274_v2  ;;  %s569_s8 = scalar_lea.hbm %s568_s7, 16  ;;  %p574_p1 = scmp.lt.s32.totalorder %s568_s7, %s769_s4 }
  0x1a   : > { %p570_p12 = scmp.ne.s32.totalorder %s568_s7, %s569_s8  ;;  %p575_p2 = scmp.lt.s32.totalorder %s573_s11, %s569_s8 }
  0x1c   : > { %p571_p13 = pnand %p570_p12, %p699_p4  ;;  %p576_p3 = por %p575_p2, %p574_p1 }
  0x1e   : > { %348 = vperm.xlu0 %552, %v345_v3   ;;  %p572_p0 = pneg %p571_p13 }
  0x20   : > { %v277_v5 = vld.sshfl [vmem:[#allocation1] sm:$0xff pattern:$0x75316420]  ;;  %v278_v6 = vld.sshfl [vmem:[#allocation1 + $0x8] sm:$0xff pattern:$0x75316420]  ;;  %p577_p5 = pnand %p576_p3, %p572_p0 }
  0x21   : > { %485 = vmatpush.msk.msra.mxu0 %vm283_vm0, %v277_v5  ;;  %487 = vmatpush.msk.msra.mxu1 %vm283_vm0, %v278_v6 }
  0x22   : > { %486 = vmatmul.msk.f32.vlgmr.msra.gmra.mxu0 %vm279_vm1, %v273_v4  ;;  %488 = vmatmul.msk.f32.vlgmr.msra.gmra.mxu1 %vm279_vm1, %v273_v4 }
  0x88   : > { %v341_v7 = vpop.permute.xlu0 %340 }
  0x90   : > { %v349_v12 = vpop.permute.xlu0 %348 }
  0x9f   : > { %v305_v8 = vpop.f32.mrf.mxu0  ;;  %v325_v9 = vpop.f32.mrf.mxu1 }
  0xa0   : > { %v343_v10 = vmul.f32 %v341_v7, %v305_v8  ;;  %v344_v11 = vmul.f32 %v341_v7, %v325_v9 }
  0xa2   : > { %v351_v13 = vadd.f32 %v349_v12, %v343_v10  ;;  %v352_v14 = vadd.f32 %v349_v12, %v344_v11 }
  0xa4   : > { %v353_v15 = vmax.f32 %v351_v13, 0.0  ;;  %v354_v16 = vmax.f32 %v352_v14, 0.0 }
  0xa6   : > { %355 = vst [vmem:[%s245_s30] sm:$0xff] %v353_v15 }
  0xa7   : > { %356 = vst [vmem:[%s245_s30 + $0x8] sm:$0xff] %v354_v16 }
  0xa8   : > { %580 = shalt.err (!%p577_p5)
}
  0xa9   : > { %496 = dma.vmem_to_hbm [thread:$0]  (%p699_p4), %s374_s5, 256, %s376_s6, %s358_s18  }
  0xaa PF: > { %p502_p6 = scmp.ge.s32.totalorder %s631_s20, 2  ;;  %s387_s14 = sand.u32 1, %s611_s15  }
  0xab   : > { %s388_s21 = scalar_lea.sflag [#allocation4], %s387_s14 }
  0xac   : > { %p499_p7 = pnand %p502_p6, %p706_p8 }
  0xae   : > { %p500_p9 = pneg %p499_p7 }
  0xb0   : > { %606 = dma.done.wait (%p500_p9), %s388_s21, 256  }
  0xb1   : > { %608 = vsyncadd (%p500_p9), %s388_s21, 4294967040  ;;  %s17_s20 = sadd.s32 1, %s631_s20   ;;  %s772_s15 = smov %s615_s16 }
  0xb2   : > { %p14_p10 = scmp.ge.s32.totalorder %s17_s20, 4   ;;  %s773_s16 = smov %s619_s17 }
  0xb3   : > { %s774_s17 = smov %s712_s28  ;;  %s775_s18 = smov %s627_s19 }
  0xb4   : > { %s776_s19 = smov %s778_s23  ;;  %16 = sbr.rel (!%p14_p10) target bundleno = 4 (0x4), region = 82 }
  0xb9   :  { %394 = vsyncpa [#allocation4], 1 }
  0xba   :  { %396 = vsyncpa [#allocation4 + $0x1], 1 }

</bundles_post_ra>
